<compile_context>
chip_gen: v7x
topology: tpu7x:2x2x1
jax: 0.10.0
libtpu: 0.0.40
codegen_flags: <defaults>
</compile_context>

<pallas_src>
import math
from functools import partial

import numpy as np
import jax
import jax.numpy as jnp
from jax import lax
from jax.experimental import pallas as pl
from jax.experimental.pallas import tpu as pltpu

EPS = 1e-10
_LANE = 128
_SQRT2 = math.sqrt(2.0)
# Keep the double-buffered per-step working set under ~12 MiB (v5e scoped-VMEM
# default is 16 MiB; v6e/v7x defaults are 32 MiB).
_VMEM_BUDGET = 12 * 1024 * 1024


def _cdiv(a, b):
    return -(-a // b)


def _round_up(n, m):
    return _cdiv(n, m) * m


def _fast_recip(x):
    # EUP approximate reciprocal + one Newton-Raphson refinement step: the divide
    # stays off the VALU slot, the result is within ~1-2 ulp of exact 1/x.
    r = pl.reciprocal(x, approx=True)
    return r * (2.0 - x * r)


# -----------------------------------------------------------------------------
# Kernels.  Layout: N (rows of the PyTorch output) lives on the 128-lane axis.
#   p_ref : (2, tn)   row 0 = mu, row 1 = sigma   (packed, single DMA stream)
#   o_ref : (K, tn)   lane-dense output block, o[k, n] = CDF(up_k) - CDF(low_k) + eps
# -----------------------------------------------------------------------------
def _laplace_edge_kernel(p_ref, e_ref, o_ref):
    # Contiguous bins: evaluate the CDF once per edge (K+1 rows), then difference
    # adjacent rows (one exp per edge instead of two per bin).
    mu = p_ref[0:1, :]                                      # (1, tn)
    neg_inv_sigma = -_fast_recip(p_ref[1:2, :])             # (1, tn)
    d = e_ref[...] - mu                                     # (K+1, tn)
    h = 0.5 - 0.5 * jnp.exp(jnp.abs(d) * neg_inv_sigma)     # 0.5*(1 - e^{-|d|/sigma})
    cdf = jnp.where(d >= 0.0, h, -h)                        # 0.5*sign(d)*(1 - e^{-|d|/s})
    o_ref[...] = (cdf[1:, :] - cdf[:-1, :]) + EPS


def _gaussian_edge_kernel(p_ref, e_ref, o_ref):
    mu = p_ref[0:1, :]                                      # (1, tn)
    inv = _fast_recip(p_ref[1:2, :] * _SQRT2)               # 1/(sqrt(2)*sigma)
    cdf = 0.5 * lax.erf((e_ref[...] - mu) * inv)            # (K+1, tn)
    o_ref[...] = (cdf[1:, :] - cdf[:-1, :]) + EPS


def _laplace_pair_kernel(p_ref, u_ref, l_ref, o_ref):
    # Generic (possibly non-contiguous) bins: two CDF evaluations per bin.
    K, tn = o_ref.shape
    # Hoist the row-constant broadcasts once (no CSE of broadcast_in_dim).
    mu_b = jnp.broadcast_to(p_ref[0:1, :], (K, tn))
    nis_b = jnp.broadcast_to(-_fast_recip(p_ref[1:2, :]), (K, tn))
    du = u_ref[...] - mu_b
    dl = l_ref[...] - mu_b
    hu = 0.5 - 0.5 * jnp.exp(jnp.abs(du) * nis_b)
    hl = 0.5 - 0.5 * jnp.exp(jnp.abs(dl) * nis_b)
    cu = jnp.where(du >= 0.0, hu, -hu)
    cl = jnp.where(dl >= 0.0, hl, -hl)
    o_ref[...] = (cu - cl) + EPS


def _gaussian_pair_kernel(p_ref, u_ref, l_ref, o_ref):
    K, tn = o_ref.shape
    mu_b = jnp.broadcast_to(p_ref[0:1, :], (K, tn))
    inv_b = jnp.broadcast_to(_fast_recip(p_ref[1:2, :] * _SQRT2), (K, tn))
    o_ref[...] = 0.5 * (lax.erf((u_ref[...] - mu_b) * inv_b)
                        - lax.erf((l_ref[...] - mu_b) * inv_b)) + EPS


# -----------------------------------------------------------------------------
# Wrapper.
# -----------------------------------------------------------------------------
def _select_tile(N, K, tn_max):
    n128 = _round_up(max(N, 1), _LANE)                       # pad only to 128
    # Cap tn so the double-buffered f32 params+output blocks fit the VMEM budget.
    budget_lanes = _VMEM_BUDGET // (2 * 4 * (K + 3))
    tn_cap = max(_LANE, (budget_lanes // _LANE) * _LANE)
    tn_max = max(_LANE, min(tn_max, tn_cap))
    if n128 <= _LANE:
        tn = _LANE
    else:
        # Prefer >= 2 grid steps so ("parallel",) can shard across v7x's two TCs.
        tn = min(tn_max, _round_up(_cdiv(n128, 2), _LANE))
    grid = _cdiv(n128, tn)                                   # ragged last block OK
    return n128, tn, grid


@partial(jax.jit, static_argnames=("dist_type", "contiguous_bins", "tn_max",
                                   "transpose_out"))
def _cdf_layer_impl(x, up, low, *, dist_type, contiguous_bins, tn_max, transpose_out):
    x = jnp.asarray(x, jnp.float32)
    up = jnp.asarray(up, jnp.float32).reshape(-1)
    low = jnp.asarray(low, jnp.float32).reshape(-1)
    N = x.shape[0]
    K = up.shape[0]
    n128, tn, grid = _select_tile(N, K, tn_max)

    # Pack mu/sigma into one lane-major (2, n128) array (single DMA stream).
    # Padded lanes get sigma=1.0 so the math stays finite; they are never stored
    # back (the ragged grid block is masked) and the [:, :N] slice drops the rest.
    pad = n128 - N
    params = jnp.stack(
        [jnp.pad(x[:, 0], (0, pad)),
         jnp.pad(x[:, 1], (0, pad), constant_values=1.0)], axis=0)

    param_spec = pl.BlockSpec((2, tn), lambda i: (0, i))
    out_spec = pl.BlockSpec((K, tn), lambda i: (0, i))
    out_shape = jax.ShapeDtypeStruct((K, n128), jnp.float32)
    cparams = pltpu.CompilerParams(dimension_semantics=("parallel",))

    if contiguous_bins:
        # Shared-edge path: K+1 edges, one CDF evaluation per edge.
        edges = jnp.concatenate([low, up[-1:]]).reshape(-1, 1)        # (K+1, 1)
        kernel = _laplace_edge_kernel if dist_type == "laplace" else _gaussian_edge_kernel
        out_t = pl.pallas_call(
            kernel,
            out_shape=out_shape,
            grid_spec=pltpu.PrefetchScalarGridSpec(
                num_scalar_prefetch=0, grid=(grid,),
                in_specs=[param_spec,
                          pl.BlockSpec((K + 1, 1), lambda i: (0, 0))],  # replicated
                out_specs=out_spec),
            compiler_params=cparams,
        )(params, edges)
    else:
        kernel = _laplace_pair_kernel if dist_type == "laplace" else _gaussian_pair_kernel
        out_t = pl.pallas_call(
            kernel,
            out_shape=out_shape,
            grid_spec=pltpu.PrefetchScalarGridSpec(
                num_scalar_prefetch=0, grid=(grid,),
                in_specs=[param_spec,
                          pl.BlockSpec((K, 1), lambda i: (0, 0)),       # up (repl.)
                          pl.BlockSpec((K, 1), lambda i: (0, 0))],      # low (repl.)
                out_specs=out_spec),
            compiler_params=cparams,
        )(params, up.reshape(-1, 1), low.reshape(-1, 1))

    out_t = out_t[:, :N]                      # (K, N) lane-dense native layout
    if transpose_out:
        return out_t.T                        # (N, K), fused inside this same jit
    return out_t


def _bins_are_contiguous(up, low):
    """True iff up[k] == low[k+1] for all k (bins share interior edges)."""
    try:
        u = np.asarray(jax.device_get(up), dtype=np.float32).reshape(-1)
        l = np.asarray(jax.device_get(low), dtype=np.float32).reshape(-1)
    except Exception:
        return False            # tracers / unknown values -> generic path
    if u.shape != l.shape or u.size == 0:
        return False
    return bool(np.all(u[:-1] == l[1:]))


def cdf_layer(x, up, low, dist_type="laplace", *, tn_max=32768):
    """CDFLayer.forward: (N, 2) [mu, sigma] -> (N, K), p = CDF(up)-CDF(low)+1e-10."""
    assert dist_type in ("laplace", "gaussian")
    return _cdf_layer_impl(
        jnp.asarray(x), jnp.asarray(up, jnp.float32), jnp.asarray(low, jnp.float32),
        dist_type=dist_type, contiguous_bins=_bins_are_contiguous(up, low),
        tn_max=tn_max, transpose_out=True)


def cdf_layer_t(x, up, low, dist_type="laplace", *, tn_max=32768):
    """Native lane-dense layout: returns cdf_layer(...).T with shape (K, N).
    Prefer this in pipelines that can consume (K, N) — it skips the transpose."""
    assert dist_type in ("laplace", "gaussian")
    return _cdf_layer_impl(
        jnp.asarray(x), jnp.asarray(up, jnp.float32), jnp.asarray(low, jnp.float32),
        dist_type=dist_type, contiguous_bins=_bins_are_contiguous(up, low),
        tn_max=tn_max, transpose_out=False)


class CDFLayer:
    """Drop-in analog of the PyTorch module (forward returns the (N, K) layout)."""

    def __init__(self, num_input=None, up=None, low=None, type="laplace"):
        assert type in ("laplace", "gaussian")
        self.up, self.low, self.type = up, low, type

    def __call__(self, x):
        return cdf_layer(x, self.up, self.low, self.type)

    forward = __call__


# --- pure-JAX reference (mirrors the PyTorch sampled_pdf) --------------------
def sampled_pdf_ref(mu_sigma, u, l, dist_type="laplace"):
    mu, sigma = mu_sigma[:, 0:1], mu_sigma[:, 1:2]
    x = jnp.asarray(u, jnp.float32).reshape(1, -1)
    x1 = jnp.asarray(l, jnp.float32).reshape(1, -1)
    if dist_type == "laplace":
        p = 0.5 * (jnp.sign(x - mu) * (1 - jnp.exp(-jnp.abs(x - mu) / sigma))
                   - jnp.sign(x1 - mu) * (1 - jnp.exp(-jnp.abs(x1 - mu) / sigma))) + EPS
    else:
        p = 0.5 * (lax.erf((x - mu) / (math.sqrt(2.0) * sigma))
                   - lax.erf((x1 - mu) / (math.sqrt(2.0) * sigma))) + EPS
    return p


if __name__ == "__main__":
    key = jax.random.PRNGKey(0)
    ok = True
    ATOL = RTOL = 5e-5

    # Three N,K configs: the original small one, a non-multiple N (padding path),
    # and one whose grid has a ragged (masked) last block.
    for (N, K) in [(16, 16), (200, 24), (300, 16)]:
        k_mu, k_sig = jax.random.split(jax.random.fold_in(key, N))
        mu = jax.random.normal(k_mu, (N, 1), dtype=jnp.float32)
        sigma = jnp.abs(jax.random.normal(k_sig, (N, 1), dtype=jnp.float32)) + 0.5
        x = jnp.concatenate([mu, sigma], axis=1)                    # (N, 2) mu_sigma

        edges = jnp.linspace(-2.0, 2.0, K + 1, dtype=jnp.float32)
        low_c, up_c = edges[:-1], edges[1:]                          # contiguous bins
        low_n = edges[:-1]                                           # gapped bins ->
        up_n = edges[:-1] + 0.6 * (edges[1:] - edges[:-1])           # generic kernels

        for (up_a, low_a) in [(up_c, low_c), (up_n, low_n)]:
            for dist_type in ("laplace", "gaussian"):
                out = jax.block_until_ready(cdf_layer(x, up_a, low_a, dist_type))
                out_t = jax.block_until_ready(cdf_layer_t(x, up_a, low_a, dist_type))
                ref = sampled_pdf_ref(x, up_a, low_a, dist_type)
                if out.shape != (N, K) or out_t.shape != (K, N):
                    ok = False
                    print("shape mismatch", N, K, dist_type, out.shape, out_t.shape)
                if not (jnp.allclose(out, ref, atol=ATOL, rtol=RTOL)
                        and jnp.allclose(out_t, ref.T, atol=ATOL, rtol=RTOL)):
                    ok = False
                    print("value mismatch", N, K, dist_type,
                          float(jnp.max(jnp.abs(out - ref))))

    # Module-style usage.
    layer = CDFLayer(up=up_c, low=low_c, type="laplace")
    out = jax.block_until_ready(layer(x))
    ref = sampled_pdf_ref(x, up_c, low_c, "laplace")
    if not jnp.allclose(out, ref, atol=ATOL, rtol=RTOL):
        ok = False
        print("class-wrapper mismatch", float(jnp.max(jnp.abs(out - ref))))

    if ok:
        print("KERNEL_OK")
</pallas_src>

<mosaic_0001>
module attributes {stable_mosaic.version = 11 : i64} {
  func.func @_laplace_edge_kernel(%arg0: i32, %arg1: memref<2x128xf32, #tpu.memory_space<vmem>>, %arg2: memref<17x1xf32, #tpu.memory_space<vmem>>, %arg3: memref<16x128xf32, #tpu.memory_space<vmem>>) attributes {dimension_semantics = [#tpu.dimension_semantics<parallel>], iteration_bounds = array<i64: 1>, scalar_prefetch = 0 : i64, scratch_operands = 0 : i64, tpu.core_type = #tpu.core_type<tc>, window_params = [{transform_indices = @transform_0, window_bounds = array<i64: 2, 128>}, {pipeline_mode = #tpu.pipeline_mode<synchronous>, transform_indices = @transform_1, window_bounds = array<i64: 17, 1>}, {transform_indices = @transform_2, window_bounds = array<i64: 16, 128>}]} {
    %c0 = arith.constant 0 : index
    %c0_0 = arith.constant 0 : index
    %0 = vector.load %arg1[%c0, %c0_0] : memref<2x128xf32, #tpu.memory_space<vmem>>, vector<1x128xf32>
    %c1 = arith.constant 1 : index
    %c0_1 = arith.constant 0 : index
    %1 = vector.load %arg1[%c1, %c0_1] : memref<2x128xf32, #tpu.memory_space<vmem>>, vector<1x128xf32>
    %2 = tpu.reciprocal %1 {approx = true} : vector<1x128xf32> -> vector<1x128xf32>
    %3 = arith.mulf %1, %2 : vector<1x128xf32>
    %cst = arith.constant 2.000000e+00 : f32
    %4 = vector.broadcast %cst : f32 to vector<1x128xf32>
    %5 = arith.subf %4, %3 : vector<1x128xf32>
    %6 = arith.mulf %2, %5 : vector<1x128xf32>
    %cst_2 = arith.constant 0.000000e+00 : f32
    %7 = vector.broadcast %cst_2 : f32 to vector<1x128xf32>
    %8 = arith.subf %7, %6 : vector<1x128xf32>
    %c0_3 = arith.constant 0 : index
    %c0_4 = arith.constant 0 : index
    %9 = vector.load %arg2[%c0_3, %c0_4] : memref<17x1xf32, #tpu.memory_space<vmem>>, vector<17x1xf32>
    %10 = vector.broadcast %9 : vector<17x1xf32> to vector<17x128xf32>
    %11 = vector.broadcast %0 : vector<1x128xf32> to vector<17x128xf32>
    %12 = arith.subf %10, %11 : vector<17x128xf32>
    %13 = math.absf %12 : vector<17x128xf32>
    %14 = vector.broadcast %8 : vector<1x128xf32> to vector<17x128xf32>
    %15 = arith.mulf %13, %14 : vector<17x128xf32>
    %16 = math.exp %15 : vector<17x128xf32>
    %cst_5 = arith.constant 5.000000e-01 : f32
    %17 = vector.broadcast %cst_5 : f32 to vector<17x128xf32>
    %18 = arith.mulf %17, %16 : vector<17x128xf32>
    %cst_6 = arith.constant 5.000000e-01 : f32
    %19 = vector.broadcast %cst_6 : f32 to vector<17x128xf32>
    %20 = arith.subf %19, %18 : vector<17x128xf32>
    %cst_7 = arith.constant 0.000000e+00 : f32
    %21 = vector.broadcast %cst_7 : f32 to vector<17x128xf32>
    %22 = arith.cmpf oge, %12, %21 : vector<17x128xf32>
    %cst_8 = arith.constant 0.000000e+00 : f32
    %23 = vector.broadcast %cst_8 : f32 to vector<17x128xf32>
    %24 = arith.subf %23, %20 : vector<17x128xf32>
    %25 = arith.select %22, %20, %24 : vector<17x128xi1>, vector<17x128xf32>
    %26 = vector.extract_strided_slice %25 {offsets = [1, 0], sizes = [16, 128], strides = [1, 1]} : vector<17x128xf32> to vector<16x128xf32>
    %27 = vector.extract_strided_slice %25 {offsets = [0, 0], sizes = [16, 128], strides = [1, 1]} : vector<17x128xf32> to vector<16x128xf32>
    %28 = arith.subf %26, %27 : vector<16x128xf32>
    %cst_9 = arith.constant 1.000000e-10 : f32
    %29 = vector.broadcast %cst_9 : f32 to vector<16x128xf32>
    %30 = arith.addf %28, %29 : vector<16x128xf32>
    %c0_10 = arith.constant 0 : index
    %c0_11 = arith.constant 0 : index
    %31 = vector.load %arg3[%c0_10, %c0_11] : memref<16x128xf32, #tpu.memory_space<vmem>>, vector<16x128xf32>
    tpu.vector_store %arg3[%c0_10, %c0_11], %30 {strides = array<i32>} : memref<16x128xf32, #tpu.memory_space<vmem>>, vector<16x128xf32>,
    return
  }
  func.func @transform_0(%arg0: i32) -> (i32, i32) {
    %c0_i32 = arith.constant 0 : i32
    %c0_i32_0 = arith.constant 0 : i32
    return %c0_i32, %arg0 : i32, i32
  }
  func.func @transform_1(%arg0: i32) -> (i32, i32) {
    %c0_i32 = arith.constant 0 : i32
    %c0_i32_0 = arith.constant 0 : i32
    %c0_i32_1 = arith.constant 0 : i32
    return %c0_i32, %c0_i32_0 : i32, i32
  }
  func.func @transform_2(%arg0: i32) -> (i32, i32) {
    %c0_i32 = arith.constant 0 : i32
    %c0_i32_0 = arith.constant 0 : i32
    return %c0_i32, %arg0 : i32, i32
  }
}

</mosaic_0001>

<bundles_post_ra>
// kernel: _cdf_layer_impl.1
= control target key start
LH: loop header
LB: loop body
LE: loop exit
PB: predicated region body
PF: predicated region fallthrough
CT: control target
= control target key end

     0   :  { %v108_v0 = vmov 0   ;;  %v46_v7 = vlaneseq  ;;  %vm76_vm2 = vcmask 1040384   ;;  %s148_s1 = inlined_call_operand.vmem [shape: f32[17,1], index: 1, kind: input, shape index: {}]   ;;  %s149_s0 = inlined_call_operand.vmem [shape: f32[2,128], index: 0, kind: input, shape index: {}]   ;;  %s150_s2 = inlined_call_operand.vmem [shape: f32[16,128], index: 2, kind: output, shape index: {}]  }
   0x1   :  { %99 = vset.pattern.permute.xlu1 %v108_v0  ;;  %98 = vset.pattern.permute.xlu0 %v108_v0  ;;  %v20_v1 = vld [vmem:[%s148_s1 + $0x10] sm:$0x1]  ;;  %v18_v2 = vld [vmem:[%s148_s1] sm:$0xff]  ;;  %v19_v3 = vld [vmem:[%s148_s1 + $0x8] sm:$0xff] }
   0x2   :  { %33 = vperm.xlu1 %99, %v20_v1   ;;  %23 = vperm.xlu0 %98, %v18_v2   ;;  %v12_v4 = vld [vmem:[%s149_s0 + $0x1] sm:$0x1]  ;;  %v47_v9 = vshrl.u32 %v46_v7, 7  ;;  %v96_v13 = vld [vmem:[%s149_s0] ss:$0 sm:$0xff] }
   0x3   :  { %100 = vrcp.f32 %v12_v4 }
   0x4   :  { %v48_v11 = vsub.s32 0, %v47_v9 }
   0x6   :  { %28 = vperm.xlu0 %98, %v19_v3  }
   0xd   :  { %v101_v5 = vpop.eup %100 }
   0xe   :  { %v14_v6 = vmul.f32 %v101_v5, %v12_v4 }
  0x10   :  { %v15_v8 = vsub.f32 2.0, %v14_v6 }
  0x12   :  { %v16_v10 = vmul.f32 %v101_v5, %v15_v8 }
  0x14   :  { %v17_v12 = vsub.f32 0.0, %v16_v10 }
  0x16   :  { %v49_v17 = vrot.slane %v17_v12, %v48_v11 }
  0x81   :  { %v34_v14 = vpop.permute.xlu1 %33  ;;  %v24_v15 = vpop.permute.xlu0 %23 }
  0x82   :  { %v42_v16 = vsub.f32 %v34_v14, %v96_v13  ;;  %v40_v18 = vsub.f32 %v24_v15, %v96_v13 }
  0x84   :  { %v45_v19 = vand.u32 2147483647, %v42_v16  ;;  %v43_v20 = vand.u32 2147483647, %v40_v18  ;;  %vm65_vm0 = vcmp.ge.f32.partialorder %v40_v18, 0.0  ;;  %vm67_vm3 = vcmp.ge.f32.partialorder %v42_v16, 0.0 }
  0x85   :  { %v29_v21 = vpop.permute.xlu0 %28 }
  0x86   :  { %v52_v22 = vmul.f32 %v49_v17, %v45_v19  ;;  %v50_v23 = vmul.f32 %v49_v17, %v43_v20  ;;  %v41_v24 = vsub.f32 %v29_v21, %v96_v13 }
  0x88   :  { %v57_v25 = vmul.f32 1.442695, %v52_v22  ;;  %v53_v26 = vmul.f32 1.442695, %v50_v23  ;;  %v44_v27 = vand.u32 2147483647, %v41_v24 }
  0x89   :  { %vm66_vm1 = vcmp.ge.f32.partialorder %v41_v24, 0.0 }
  0x8a   :  { %102 = vpow2.f32 %v57_v25  ;;  %v51_v28 = vmul.f32 %v49_v17, %v44_v27 }
  0x8b   :  { %104 = vpow2.f32 %v53_v26 }
  0x8c   :  { %v55_v29 = vmul.f32 1.442695, %v51_v28 }
  0x8e   :  { %106 = vpow2.f32 %v55_v29 }
  0x94   :  { %v103_v30 = vpop.eup %102 }
  0x95   :  { %v105_v31 = vpop.eup %104  ;;  %v61_v32 = vmul.f32 0.5, %v103_v30 }
  0x96   :  { %v59_v33 = vmul.f32 0.5, %v105_v31 }
  0x97   :  { %v64_v36 = vsub.f32 0.5, %v61_v32 }
  0x98   :  { %v107_v34 = vpop.eup %106  ;;  %v62_v35 = vsub.f32 0.5, %v59_v33 }
  0x99   :  { %v60_v37 = vmul.f32 0.5, %v107_v34  ;;  %v70_v41 = vsub.f32 0.0, %v64_v36 }
  0x9a   :  { %v68_v38 = vsub.f32 0.0, %v62_v35 }
  0x9b   :  { %v63_v39 = vsub.f32 0.5, %v60_v37  ;;  %v73_v47 = vsel %vm67_vm3, %v64_v36, %v70_v41 }
  0x9c   :  { %v71_v40 = vsel %vm65_vm0, %v62_v35, %v68_v38 }
  0x9d   :  { %v77_v42 = vrot.slane %v71_v40, 7  ;;  %v69_v43 = vsub.f32 0.0, %v63_v39 }
  0x9f   :  { %v83_v44 = vsub.f32 %v71_v40, %v77_v42  ;;  %v72_v45 = vsel %vm66_vm1, %v63_v39, %v69_v43 }
  0xa0   :  { %v78_v46 = vrot.slane %v72_v45, 7 }
  0xa1   :  { %v86_v48 = vadd.f32 1e-10, %v83_v44 }
  0xa2   :  { %v79_v49 = vsel %vm76_vm2, %v77_v42, %v78_v46  ;;  %v85_v50 = vsub.f32 %v73_v47, %v78_v46 }
  0xa3   :  { %89 = vst [vmem:[%s150_s2 - $0x1] sm:$0xfe] %v86_v48  ;;  %v84_v51 = vsub.f32 %v72_v45, %v79_v49 }
  0xa4   :  { %v88_v52 = vadd.f32 1e-10, %v85_v50 }
  0xa5   :  { %v87_v53 = vadd.f32 1e-10, %v84_v51 }
  0xa6   :  { %91 = vst [vmem:[%s150_s2 + $0xf] sm:$0x1] %v88_v52 }
  0xa7   :  { %90 = vst [vmem:[%s150_s2 + $0x7] sm:$0xff] %v87_v53 }

</bundles_post_ra>
